<compile_context>
chip_gen: v5e
topology: v5e:2x2
jax: 0.10.0
libtpu: 0.0.40
codegen_flags: <defaults>
</compile_context>

<pallas_src>
import jax
import jax.numpy as jnp
from jax import lax
from jax.experimental import pallas as pl
from jax.experimental.pallas import tpu as pltpu

_NEG_BIG = -1e30  # finite stand-in for -inf (keeps max()/exp() NaN-free;
                  # do NOT "upgrade" to -jnp.inf — exp(m_prev - m_new) relies
                  # on clean underflow to 0 on the first tile)


def _round_up(x, mult):
    return (x + mult - 1) // mult * mult


def make_circle_loss_kernel(gamma, m, num_classes, mask_tail):
    gamma = float(gamma)
    m = float(m)
    delta_p = 1.0 - m
    delta_n = m

    def kernel(feat_ref, labels_ref, w_ref, out_ref, m_acc, l_acc, pos_acc):
        c_idx = pl.program_id(0)

        @pl.when(c_idx == 0)
        def _init():
            m_acc[...] = jnp.full_like(m_acc, _NEG_BIG)
            l_acc[...] = jnp.zeros_like(l_acc)
            pos_acc[...] = jnp.zeros_like(pos_acc)

        feat = feat_ref[...]            # (B, F)  storage/compute dtype -> MXU
        w = w_ref[...]                  # (F, Ct) storage/compute dtype -> MXU
        labels = labels_ref[...]        # (B, 1)  int32

        # Per-class 1/||w_c|| as a (1, Ct) lane vector.  Upcast BEFORE the
        # square so bf16-stored weights (~0.01 magnitude) keep precision.
        wf = w.astype(jnp.float32)
        sumsq = jnp.sum(wf * wf, axis=0, keepdims=True)           # (1, Ct)
        inv_norm = lax.rsqrt(jnp.maximum(sumsq, 1e-24))           # == 1/max(||w||,1e-12)

        # MXU matmul in storage dtype, f32 accumulation; normalize afterwards
        # by scaling the (B, Ct) logits instead of the (F, Ct) weight tile.
        logits = jnp.dot(feat, w, preferred_element_type=jnp.float32)  # (B, Ct)
        logits = jnp.clip(logits * inv_norm, -1.0, 1.0)

        B, Ct = logits.shape
        cls = lax.broadcasted_iota(jnp.int32, (B, Ct), 1) + c_idx * Ct
        p_mask = cls == labels                                    # (B, Ct)

        # Positive logit per row (only for rows whose label lives in this
        # tile); the positive circle branch runs on a (B, 1) vector only.
        p_f = jnp.where(p_mask, 1.0, 0.0)
        has_pos = jnp.sum(p_f, axis=1, keepdims=True)             # 0.0 or 1.0
        s_p = jnp.sum(p_f * logits, axis=1, keepdims=True)        # (B, 1)
        pos_val = (jnp.maximum(1.0 + m - s_p, 0.0)
                   * (s_p - delta_p) * gamma) * has_pos           # (B, 1)
        pos_acc[...] += pos_val

        # Negative branch over the whole tile; the positive column is patched
        # with pos_val via a single select.
        neg_val = jnp.maximum(logits + delta_n, 0.0) * (logits - delta_n) * gamma
        new_logits = jnp.where(p_mask, pos_val, neg_val)          # (B, Ct)
        if mask_tail:
            new_logits = jnp.where(cls < num_classes, new_logits, _NEG_BIG)

        # Online (streaming) logsumexp across class tiles.
        m_prev = m_acc[...]
        m_new = jnp.maximum(m_prev, jnp.max(new_logits, axis=1, keepdims=True))
        l_acc[...] = (jnp.exp(m_prev - m_new) * l_acc[...]
                      + jnp.sum(jnp.exp(new_logits - m_new), axis=1,
                                keepdims=True))
        m_acc[...] = m_new

        @pl.when(c_idx == pl.num_programs(0) - 1)
        def _finalize():
            # logsumexp(new_logits - s_p) == (m + log l) - s_p
            lse = m_acc[...] + jnp.log(l_acc[...])                # (B, 1)
            out_ref[...] = jnp.mean(lse - pos_acc[...], axis=(0, 1),
                                    keepdims=True)                # (1, 1)

    return kernel


def _pick_class_tile(C, F, itemsize, *, target_block_bytes, max_block_bytes):
    """Lane-dense (multiple-of-128) class-tile width: big enough that each
    streamed weight block (~target_block_bytes) hides the ~0.35 us grid-step
    overhead, small enough (<= max_block_bytes per buffer) that the
    multi-buffered stream + temporaries fit v7x's 64 MiB VMEM."""
    c_pad_full = _round_up(C, 128)
    per_col_bytes = max(F * itemsize, 1)
    ct = max(128, (target_block_bytes // per_col_bytes) // 128 * 128)
    ct_cap = max(128, (max_block_bytes // per_col_bytes) // 128 * 128)
    return min(ct, ct_cap, c_pad_full)


def circle_loss(features, labels, weight, *, gamma, m,
                weight_dtype=jnp.bfloat16,
                c_tile=None,
                target_block_bytes=4 << 20,
                max_block_bytes=16 << 20,
                weight_buffers=2):
    """CircleLoss forward.  `weight` is (num_classes, num_features) (torch layout).

    Precondition: every label is in [0, num_classes) (exactly one positive per
    row).  `weight_dtype` is the streamed/compute dtype: bf16 (default) halves
    the HBM traffic of the weight stream; pass jnp.float32 for the
    bit-faithful path."""
    B, F = features.shape
    C = weight.shape[0]
    cdt = jnp.dtype(weight_dtype)

    labels2d = labels.astype(jnp.int32).reshape(B, 1)
    # Pre-transpose to (F, C): the MXU consumes the tile directly (no in-kernel
    # transpose) and the per-class inv-norm is a natural (1, C) lane vector.
    w_t = weight.T.astype(cdt)
    feats = features.astype(cdt)

    if c_tile is None:
        ct = _pick_class_tile(C, F, cdt.itemsize,
                              target_block_bytes=target_block_bytes,
                              max_block_bytes=max_block_bytes)
    else:
        assert c_tile % 128 == 0, "class tile must be a multiple of 128"
        ct = min(c_tile, _round_up(C, 128))

    c_pad = _round_up(C, ct)
    if c_pad != C:
        w_t = jnp.pad(w_t, ((0, 0), (0, c_pad - C)))
    n_tiles = c_pad // ct
    mask_tail = c_pad != C

    kernel = make_circle_loss_kernel(gamma, m, num_classes=C,
                                     mask_tail=mask_tail)

    # VMEM budget: multi-buffered weight stream + resident feature / label
    # blocks + (B, ct) f32 temporaries + scratch, with 25% headroom.  Clamped
    # to stay below v7x's 64 MiB physical VMEM (v5e/v6e have 128 MiB).
    w_block_bytes = F * ct * cdt.itemsize
    vmem_bytes = (weight_buffers * w_block_bytes
                  + 2 * B * F * cdt.itemsize                 # resident features
                  + 2 * _round_up(B, 8) * 128 * 4            # labels block (padded)
                  + 8 * B * ct * 4                           # (B, ct) f32 temporaries
                  + 4 * _round_up(B, 8) * 128 * 4)           # scratch + output
    vmem_limit = int(min(60 << 20, max(int(vmem_bytes * 1.25), 16 << 20)))

    w_spec_kwargs = {}
    if weight_buffers != 2:
        # Deeper pipelining on the streamed weight only (features stay default).
        w_spec_kwargs["pipeline_mode"] = pl.Buffered(weight_buffers)

    out = pl.pallas_call(
        kernel,
        out_shape=jax.ShapeDtypeStruct((1, 1), jnp.float32),
        grid_spec=pltpu.PrefetchScalarGridSpec(
            num_scalar_prefetch=0,
            grid=(n_tiles,),
            in_specs=[
                # features & labels: constant block index -> DMA'd once,
                # resident in VMEM across all class tiles.
                pl.BlockSpec((B, F), lambda c: (0, 0)),
                pl.BlockSpec((B, 1), lambda c: (0, 0)),
                # weight tiles stream (multi-buffered) along the class axis.
                pl.BlockSpec((F, ct), lambda c: (0, c), **w_spec_kwargs),
            ],
            out_specs=pl.BlockSpec((1, 1), lambda c: (0, 0)),
            scratch_shapes=[pltpu.VMEM((B, 1), jnp.float32),   # running max
                            pltpu.VMEM((B, 1), jnp.float32),   # running sum
                            pltpu.VMEM((B, 1), jnp.float32)],  # positive value
        ),
        compiler_params=pltpu.CompilerParams(
            # Class axis carries the online-logsumexp accumulator (reduction).
            dimension_semantics=("arbitrary",),
            vmem_limit_bytes=vmem_limit,
        ),
    )(feats, labels2d, w_t)
    return out[0, 0]


def circle_loss_ref(features, labels, weight, *, gamma, m):
    """Pure-JAX reference mirroring the PyTorch forward."""
    norm = jnp.sqrt(jnp.sum(weight * weight, axis=1, keepdims=True))
    w_n = weight / jnp.maximum(norm, 1e-12)
    logits = jnp.clip(features @ w_n.T, -1.0, 1.0)
    C = weight.shape[0]
    p_mask = jnp.arange(C)[None, :] == labels[:, None]
    alpha_p = jnp.maximum(-logits + 1.0 + m, 0.0)
    alpha_n = jnp.maximum(logits + m, 0.0)
    new_logits = jnp.where(p_mask,
                           alpha_p * (logits - (1.0 - m)) * gamma,
                           alpha_n * (logits - m) * gamma)
    pos = jnp.sum(jnp.where(p_mask, new_logits, 0.0), axis=1, keepdims=True)
    diff = new_logits - pos
    return jnp.mean(jax.scipy.special.logsumexp(diff, axis=1))


if __name__ == "__main__":
    gamma, m = 64.0, 0.25
    key = jax.random.PRNGKey(0)
    k_w, k_f, k_l, k_w2, k_f2, k_l2 = jax.random.split(key, 6)

    # --- small shapes consistent with the module ---------------------------
    B, C, F = 8, 16, 32
    weight = 0.01 * jax.random.normal(k_w, (C, F), dtype=jnp.float32)
    features = jax.random.normal(k_f, (B, F), dtype=jnp.float32)
    labels = jax.random.randint(k_l, (B,), 0, C, dtype=jnp.int32)

    # 1) f32 path (single lane-dense class tile, C padded 16 -> 128) against
    #    the exact f32 reference.  dot-then-scale (+ rsqrt) reorders the
    #    normalization arithmetic vs the reference and gamma=64 amplifies
    #    ulp drift -> 1e-3 tolerance.
    loss_f32 = jax.block_until_ready(
        circle_loss(features, labels, weight, gamma=gamma, m=m,
                    weight_dtype=jnp.float32))
    ref_f32 = circle_loss_ref(features, labels, weight, gamma=gamma, m=m)
    assert jnp.allclose(loss_f32, ref_f32, rtol=1e-3, atol=1e-3), (loss_f32, ref_f32)

    # 2) default bf16-streaming path, validated against a reference fed the
    #    same bf16-cast operands (checks the kernel math; the dtype change is
    #    the intentional bandwidth optimization).
    loss_bf16 = jax.block_until_ready(
        circle_loss(features, labels, weight, gamma=gamma, m=m))
    ref_bf16 = circle_loss_ref(
        features.astype(jnp.bfloat16).astype(jnp.float32), labels,
        weight.astype(jnp.bfloat16).astype(jnp.float32), gamma=gamma, m=m)
    assert jnp.allclose(loss_bf16, ref_bf16, rtol=2e-3, atol=2e-3), (loss_bf16, ref_bf16)

    # --- streamed multi-tile path with tail masking (C=300, forced ct=128) --
    B2, C2, F2 = 8, 300, 32
    weight2 = 0.01 * jax.random.normal(k_w2, (C2, F2), dtype=jnp.float32)
    features2 = jax.random.normal(k_f2, (B2, F2), dtype=jnp.float32)
    labels2 = jax.random.randint(k_l2, (B2,), 0, C2, dtype=jnp.int32)

    loss2 = jax.block_until_ready(
        circle_loss(features2, labels2, weight2, gamma=gamma, m=m,
                    weight_dtype=jnp.float32, c_tile=128))
    ref2 = circle_loss_ref(features2, labels2, weight2, gamma=gamma, m=m)
    assert jnp.allclose(loss2, ref2, rtol=1e-3, atol=1e-3), (loss2, ref2)

    print("KERNEL_OK")
</pallas_src>

<mosaic_0001>
module attributes {stable_mosaic.version = 11 : i64} {
  func.func @kernel(%arg0: i32, %arg1: memref<8x32xf32, #tpu.memory_space<vmem>>, %arg2: memref<8x1xi32, #tpu.memory_space<vmem>>, %arg3: memref<32x128xf32, #tpu.memory_space<vmem>>, %arg4: memref<1x1xf32, #tpu.memory_space<vmem>>, %arg5: memref<8x1xf32, #tpu.memory_space<vmem>>, %arg6: memref<8x1xf32, #tpu.memory_space<vmem>>, %arg7: memref<8x1xf32, #tpu.memory_space<vmem>>) attributes {dimension_semantics = [#tpu.dimension_semantics<arbitrary>], iteration_bounds = array<i64: 1>, scalar_prefetch = 0 : i64, scratch_operands = 3 : i64, tpu.core_type = #tpu.core_type<tc>, window_params = [{pipeline_mode = #tpu.pipeline_mode<synchronous>, transform_indices = @transform_0, window_bounds = array<i64: 8, 32>}, {pipeline_mode = #tpu.pipeline_mode<synchronous>, transform_indices = @transform_1, window_bounds = array<i64: 8, 1>}, {transform_indices = @transform_2, window_bounds = array<i64: 32, 128>}, {pipeline_mode = #tpu.pipeline_mode<synchronous>, transform_indices = @transform_3, window_bounds = array<i64: 1, 1>}]} {
    %c0_i32 = arith.constant 0 : i32
    %0 = arith.cmpi eq, %arg0, %c0_i32 : i32
    %1 = arith.extui %0 : i1 to i32
    %c0_i32_0 = arith.constant 0 : i32
    %2 = arith.cmpi ne, %1, %c0_i32_0 : i32
    scf.if %2 {
      %cst_39 = arith.constant -1.000000e+30 : f32
      %81 = vector.broadcast %cst_39 : f32 to vector<8x1xf32>
      %c0_40 = arith.constant 0 : index
      %c0_41 = arith.constant 0 : index
      %82 = vector.load %arg5[%c0_40, %c0_41] : memref<8x1xf32, #tpu.memory_space<vmem>>, vector<8x1xf32>
      tpu.vector_store %arg5[%c0_40, %c0_41], %81 {strides = array<i32>} : memref<8x1xf32, #tpu.memory_space<vmem>>, vector<8x1xf32>,
      %cst_42 = arith.constant 0.000000e+00 : f32
      %83 = vector.broadcast %cst_42 : f32 to vector<8x1xf32>
      %c0_43 = arith.constant 0 : index
      %c0_44 = arith.constant 0 : index
      %84 = vector.load %arg6[%c0_43, %c0_44] : memref<8x1xf32, #tpu.memory_space<vmem>>, vector<8x1xf32>
      tpu.vector_store %arg6[%c0_43, %c0_44], %83 {strides = array<i32>} : memref<8x1xf32, #tpu.memory_space<vmem>>, vector<8x1xf32>,
      %cst_45 = arith.constant 0.000000e+00 : f32
      %85 = vector.broadcast %cst_45 : f32 to vector<8x1xf32>
      %c0_46 = arith.constant 0 : index
      %c0_47 = arith.constant 0 : index
      %86 = vector.load %arg7[%c0_46, %c0_47] : memref<8x1xf32, #tpu.memory_space<vmem>>, vector<8x1xf32>
      tpu.vector_store %arg7[%c0_46, %c0_47], %85 {strides = array<i32>} : memref<8x1xf32, #tpu.memory_space<vmem>>, vector<8x1xf32>,
    } else {
    }
    %c0 = arith.constant 0 : index
    %c0_1 = arith.constant 0 : index
    %3 = vector.load %arg1[%c0, %c0_1] : memref<8x32xf32, #tpu.memory_space<vmem>>, vector<8x32xf32>
    %c0_2 = arith.constant 0 : index
    %c0_3 = arith.constant 0 : index
    %4 = vector.load %arg3[%c0_2, %c0_3] : memref<32x128xf32, #tpu.memory_space<vmem>>, vector<32x128xf32>
    %c0_4 = arith.constant 0 : index
    %c0_5 = arith.constant 0 : index
    %5 = vector.load %arg2[%c0_4, %c0_5] : memref<8x1xi32, #tpu.memory_space<vmem>>, vector<8x1xi32>
    %6 = arith.mulf %4, %4 : vector<32x128xf32>
    %cst = arith.constant dense<0.000000e+00> : vector<128xf32>
    %7 = vector.multi_reduction <add>, %6, %cst [0] : vector<32x128xf32> to vector<128xf32>
    %8 = vector.shape_cast %7 : vector<128xf32> to vector<1x128xf32>
    %cst_6 = arith.constant 1.000000e-24 : f32
    %9 = vector.broadcast %cst_6 : f32 to vector<1x128xf32>
    %10 = arith.maximumf %8, %9 : vector<1x128xf32>
    %11 = math.rsqrt %10 : vector<1x128xf32>
    %cst_7 = arith.constant dense<0.000000e+00> : vector<8x128xf32>
    %12 = tpu.matmul %3, %4, %cst_7 {dimension_numbers = #tpu.dot_dimension_numbers<[1], [0], [0], [1], [0, 0, 1, 1], [], []>} : vector<8x32xf32>, vector<32x128xf32>, vector<8x128xf32> -> vector<8x128xf32>
    %13 = vector.broadcast %11 : vector<1x128xf32> to vector<8x128xf32>
    %14 = arith.mulf %12, %13 : vector<8x128xf32>
    %cst_8 = arith.constant -1.000000e+00 : f32
    %cst_9 = arith.constant 1.000000e+00 : f32
    %15 = vector.broadcast %cst_8 : f32 to vector<8x128xf32>
    %16 = arith.maximumf %15, %14 : vector<8x128xf32>
    %17 = vector.broadcast %cst_9 : f32 to vector<8x128xf32>
    %18 = arith.minimumf %17, %16 : vector<8x128xf32>
    %19 = tpu.iota {dimensions = array<i32: 1>} : vector<8x128xi32>
    %c128_i32 = arith.constant 128 : i32
    %20 = arith.muli %arg0, %c128_i32 : i32
    %21 = vector.broadcast %20 : i32 to vector<8x128xi32>
    %22 = arith.addi %19, %21 : vector<8x128xi32>
    %23 = vector.broadcast %5 : vector<8x1xi32> to vector<8x128xi32>
    %24 = arith.cmpi eq, %22, %23 : vector<8x128xi32>
    %cst_10 = arith.constant 1.000000e+00 : f32
    %cst_11 = arith.constant 0.000000e+00 : f32
    %25 = vector.broadcast %cst_10 : f32 to vector<8x128xf32>
    %26 = vector.broadcast %cst_11 : f32 to vector<8x128xf32>
    %27 = arith.select %24, %25, %26 : vector<8x128xi1>, vector<8x128xf32>
    %cst_12 = arith.constant dense<0.000000e+00> : vector<8xf32>
    %28 = vector.multi_reduction <add>, %27, %cst_12 [1] : vector<8x128xf32> to vector<8xf32>
    %29 = vector.shape_cast %28 : vector<8xf32> to vector<8x1xf32>
    %30 = arith.mulf %27, %18 : vector<8x128xf32>
    %cst_13 = arith.constant dense<0.000000e+00> : vector<8xf32>
    %31 = vector.multi_reduction <add>, %30, %cst_13 [1] : vector<8x128xf32> to vector<8xf32>
    %32 = vector.shape_cast %31 : vector<8xf32> to vector<8x1xf32>
    %cst_14 = arith.constant 1.250000e+00 : f32
    %33 = vector.broadcast %cst_14 : f32 to vector<8x1xf32>
    %34 = arith.subf %33, %32 : vector<8x1xf32>
    %cst_15 = arith.constant 0.000000e+00 : f32
    %35 = vector.broadcast %cst_15 : f32 to vector<8x1xf32>
    %36 = arith.maximumf %34, %35 : vector<8x1xf32>
    %cst_16 = arith.constant 7.500000e-01 : f32
    %37 = vector.broadcast %cst_16 : f32 to vector<8x1xf32>
    %38 = arith.subf %32, %37 : vector<8x1xf32>
    %39 = arith.mulf %36, %38 : vector<8x1xf32>
    %cst_17 = arith.constant 6.400000e+01 : f32
    %40 = vector.broadcast %cst_17 : f32 to vector<8x1xf32>
    %41 = arith.mulf %39, %40 : vector<8x1xf32>
    %42 = arith.mulf %41, %29 : vector<8x1xf32>
    %c0_18 = arith.constant 0 : index
    %c0_19 = arith.constant 0 : index
    %43 = vector.load %arg7[%c0_18, %c0_19] : memref<8x1xf32, #tpu.memory_space<vmem>>, vector<8x1xf32>
    %44 = arith.addf %43, %42 : vector<8x1xf32>
    %c0_20 = arith.constant 0 : index
    %c0_21 = arith.constant 0 : index
    %45 = vector.load %arg7[%c0_20, %c0_21] : memref<8x1xf32, #tpu.memory_space<vmem>>, vector<8x1xf32>
    tpu.vector_store %arg7[%c0_20, %c0_21], %44 {strides = array<i32>} : memref<8x1xf32, #tpu.memory_space<vmem>>, vector<8x1xf32>,
    %cst_22 = arith.constant 2.500000e-01 : f32
    %46 = vector.broadcast %cst_22 : f32 to vector<8x128xf32>
    %47 = arith.addf %18, %46 : vector<8x128xf32>
    %cst_23 = arith.constant 0.000000e+00 : f32
    %48 = vector.broadcast %cst_23 : f32 to vector<8x128xf32>
    %49 = arith.maximumf %47, %48 : vector<8x128xf32>
    %cst_24 = arith.constant 2.500000e-01 : f32
    %50 = vector.broadcast %cst_24 : f32 to vector<8x128xf32>
    %51 = arith.subf %18, %50 : vector<8x128xf32>
    %52 = arith.mulf %49, %51 : vector<8x128xf32>
    %cst_25 = arith.constant 6.400000e+01 : f32
    %53 = vector.broadcast %cst_25 : f32 to vector<8x128xf32>
    %54 = arith.mulf %52, %53 : vector<8x128xf32>
    %55 = vector.shape_cast %42 : vector<8x1xf32> to vector<8x1xf32>
    %56 = vector.broadcast %55 : vector<8x1xf32> to vector<8x128xf32>
    %57 = arith.select %24, %56, %54 : vector<8x128xi1>, vector<8x128xf32>
    %c16_i32 = arith.constant 16 : i32
    %58 = vector.broadcast %c16_i32 : i32 to vector<8x128xi32>
    %59 = arith.cmpi slt, %22, %58 : vector<8x128xi32>
    %cst_26 = arith.constant -1.000000e+30 : f32
    %60 = vector.broadcast %cst_26 : f32 to vector<8x128xf32>
    %61 = arith.select %59, %57, %60 : vector<8x128xi1>, vector<8x128xf32>
    %c0_27 = arith.constant 0 : index
    %c0_28 = arith.constant 0 : index
    %62 = vector.load %arg5[%c0_27, %c0_28] : memref<8x1xf32, #tpu.memory_space<vmem>>, vector<8x1xf32>
    %cst_29 = arith.constant dense<0xFF800000> : vector<8xf32>
    %63 = vector.multi_reduction <maximumf>, %61, %cst_29 [1] : vector<8x128xf32> to vector<8xf32>
    %64 = vector.shape_cast %63 : vector<8xf32> to vector<8x1xf32>
    %65 = arith.maximumf %62, %64 : vector<8x1xf32>
    %66 = arith.subf %62, %65 : vector<8x1xf32>
    %67 = math.exp %66 : vector<8x1xf32>
    %c0_30 = arith.constant 0 : index
    %c0_31 = arith.constant 0 : index
    %68 = vector.load %arg6[%c0_30, %c0_31] : memref<8x1xf32, #tpu.memory_space<vmem>>, vector<8x1xf32>
    %69 = arith.mulf %67, %68 : vector<8x1xf32>
    %70 = vector.broadcast %65 : vector<8x1xf32> to vector<8x128xf32>
    %71 = arith.subf %61, %70 : vector<8x128xf32>
    %72 = math.exp %71 : vector<8x128xf32>
    %cst_32 = arith.constant dense<0.000000e+00> : vector<8xf32>
    %73 = vector.multi_reduction <add>, %72, %cst_32 [1] : vector<8x128xf32> to vector<8xf32>
    %74 = vector.shape_cast %73 : vector<8xf32> to vector<8x1xf32>
    %75 = arith.addf %69, %74 : vector<8x1xf32>
    %c0_33 = arith.constant 0 : index
    %c0_34 = arith.constant 0 : index
    %76 = vector.load %arg6[%c0_33, %c0_34] : memref<8x1xf32, #tpu.memory_space<vmem>>, vector<8x1xf32>
    tpu.vector_store %arg6[%c0_33, %c0_34], %75 {strides = array<i32>} : memref<8x1xf32, #tpu.memory_space<vmem>>, vector<8x1xf32>,
    %c0_35 = arith.constant 0 : index
    %c0_36 = arith.constant 0 : index
    %77 = vector.load %arg5[%c0_35, %c0_36] : memref<8x1xf32, #tpu.memory_space<vmem>>, vector<8x1xf32>
    tpu.vector_store %arg5[%c0_35, %c0_36], %65 {strides = array<i32>} : memref<8x1xf32, #tpu.memory_space<vmem>>, vector<8x1xf32>,
    %c0_i32_37 = arith.constant 0 : i32
    %78 = arith.cmpi eq, %arg0, %c0_i32_37 : i32
    %79 = arith.extui %78 : i1 to i32
    %c0_i32_38 = arith.constant 0 : i32
    %80 = arith.cmpi ne, %79, %c0_i32_38 : i32
    scf.if %80 {
      %c0_39 = arith.constant 0 : index
      %c0_40 = arith.constant 0 : index
      %81 = vector.load %arg5[%c0_39, %c0_40] : memref<8x1xf32, #tpu.memory_space<vmem>>, vector<8x1xf32>
      %c0_41 = arith.constant 0 : index
      %c0_42 = arith.constant 0 : index
      %82 = vector.load %arg6[%c0_41, %c0_42] : memref<8x1xf32, #tpu.memory_space<vmem>>, vector<8x1xf32>
      %83 = math.log %82 : vector<8x1xf32>
      %84 = arith.addf %81, %83 : vector<8x1xf32>
      %c0_43 = arith.constant 0 : index
      %c0_44 = arith.constant 0 : index
      %85 = vector.load %arg7[%c0_43, %c0_44] : memref<8x1xf32, #tpu.memory_space<vmem>>, vector<8x1xf32>
      %86 = arith.subf %84, %85 : vector<8x1xf32>
      %87 = vector.shape_cast %86 : vector<8x1xf32> to vector<1x8x1xf32>
      %cst_45 = arith.constant dense<0.000000e+00> : vector<1xf32>
      %88 = vector.multi_reduction <add>, %87, %cst_45 [1, 2] : vector<1x8x1xf32> to vector<1xf32>
      %89 = vector.shape_cast %88 : vector<1xf32> to vector<1x1x1xf32>
      %90 = vector.extract %89[0, 0, 0] : f32 from vector<1x1x1xf32>
      %91 = vector.broadcast %90 : f32 to vector<1x1xf32>
      %cst_46 = arith.constant 8.000000e+00 : f32
      %92 = vector.broadcast %cst_46 : f32 to vector<1x1xf32>
      %93 = arith.divf %91, %92 : vector<1x1xf32>
      %c0_47 = arith.constant 0 : index
      %c0_48 = arith.constant 0 : index
      %94 = vector.load %arg4[%c0_47, %c0_48] : memref<1x1xf32, #tpu.memory_space<vmem>>, vector<1x1xf32>
      tpu.vector_store %arg4[%c0_47, %c0_48], %93 {strides = array<i32>} : memref<1x1xf32, #tpu.memory_space<vmem>>, vector<1x1xf32>,
    } else {
    }
    return
  }
  func.func @transform_0(%arg0: i32) -> (i32, i32) {
    %c0_i32 = arith.constant 0 : i32
    %c0_i32_0 = arith.constant 0 : i32
    %c0_i32_1 = arith.constant 0 : i32
    return %c0_i32, %c0_i32_0 : i32, i32
  }
  func.func @transform_1(%arg0: i32) -> (i32, i32) {
    %c0_i32 = arith.constant 0 : i32
    %c0_i32_0 = arith.constant 0 : i32
    %c0_i32_1 = arith.constant 0 : i32
    return %c0_i32, %c0_i32_0 : i32, i32
  }
  func.func @transform_2(%arg0: i32) -> (i32, i32) {
    %c0_i32 = arith.constant 0 : i32
    %c0_i32_0 = arith.constant 0 : i32
    return %c0_i32, %arg0 : i32, i32
  }
  func.func @transform_3(%arg0: i32) -> (i32, i32) {
    %c0_i32 = arith.constant 0 : i32
    %c0_i32_0 = arith.constant 0 : i32
    %c0_i32_1 = arith.constant 0 : i32
    return %c0_i32, %c0_i32_0 : i32, i32
  }
}

</mosaic_0001>

<bundles_post_ra>
// kernel: tpu_custom_call.1
= control target key start
LH: loop header
LB: loop body
LE: loop exit
PB: predicated region body
PF: predicated region fallthrough
CT: control target
= control target key end

     0   :  { %8 = vsyncpa [#allocation6], 0  ;;  %s326_s0 = inlined_call_operand.vmem [shape: f32[8,32], index: 0, kind: input, shape index: {}]   ;;  %s327_s1 = inlined_call_operand.vmem [shape: s32[8,1], index: 1, kind: input, shape index: {}]   ;;  %s328_s2 = inlined_call_operand.hbm [shape: f32[32,128], index: 2, kind: input, shape index: {}]   ;;  %s329_s3 = inlined_call_operand.hbm [shape: f32[1,1], index: 3, kind: output, shape index: {}]  }
   0x1   :  { %9 = vsyncpa [#allocation7], 0  ;;  %s18_s14 = sshll.u32 %s328_s2, 4  ;;  %s277_s15 = smov [#allocation5]   ;;  %s19_s14 = int_to_ptr.hbm [resolvable:$true] %s18_s14 }
   0x2   :  { %s20_s16 = sshll.u32 %s277_s15, 4  ;;  %s278_s17 = smov 128   ;;  %s21_s16 = int_to_ptr.vmem [resolvable:$true] %s20_s16 }
   0x3   :  { %s279_s18 = smov 8  }
   0x4   :  { %26 = dma.hbm_to_vmem [thread:$0]  %s19_s14, 512, %s21_s16, [#allocation6], %s278_s17, %s278_s17, %s279_s18  }
   0x5   :  { %273 = dma.done.wait [#allocation6], 512  }
   0x6   :  { %274 = vsyncadd [#allocation6], 4294966784  ;;  %v280_v0 = vmov 0   ;;  %v43_v1 = vld [vmem:[#allocation5 + $0x18] sm:$0xff]  ;;  %v42_v2 = vld [vmem:[#allocation5 + $0x10] sm:$0xff]  ;;  %vm69_vm0 = vcmask 261120   ;;  %v96_v22 = vlaneseq }
   0x7   :  { %213 = vset.pattern.permute.xlu0 %v280_v0  ;;  %214 = vset.pattern.permute.xlu2 %v280_v0  ;;  %v41_v3 = vld [vmem:[#allocation5 + $0x8] sm:$0xff]  ;;  %v40_v5 = vld [vmem:[#allocation5] sm:$0xff]  ;;  %v47_v7 = vmul.f32 %v42_v2, %v42_v2  ;;  %v48_v9 = vmul.f32 %v43_v1, %v43_v1  ;;  %vm35_vm1 = vcmask 7168   ;;  %v281_v23 = vmov 0.0   ;;  %s189_s24 = sshll.u32 %s329_s3, 4  ;;  %s190_s24 = int_to_ptr.hbm [resolvable:$true] %s189_s24 }
   0x8   :  { %85 = vmatpush.msra.mxu0 %v43_v1  ;;  %v46_v4 = vmul.f32 %v41_v3, %v41_v3  ;;  %v44_v6 = vld [vmem:[%s327_s1] sm:$0xff]  ;;  %v45_v8 = vmul.f32 %v40_v5, %v40_v5  ;;  %37 = vst.msk [vmem:[#allocation3] sm:$0xff] %vm35_vm1, %v281_v23  ;;  %v97_v25 = vand.u32 127, %v96_v22  ;;  %v282_v37 = vmov -1e+30  }
   0x9   :  { %102 = vperm.xlu0 %213, %v44_v6   ;;  %v39_v11 = vld [vmem:[%s326_s0] sm:$0xff]  ;;  %38 = vst.msk [vmem:[#allocation4] sm:$0xff] %vm35_vm1, %v281_v23  ;;  %s284_s0 = smov [#allocation8]   ;;  %vm180_vm8 = vcmask 0  }
   0xa   :  { %86 = vmatpush.msra.mxu0 %v42_v2  ;;  %v49_v10 = vadd.f32 %v46_v4, %v45_v8  ;;  %36 = vst.msk [vmem:[#allocation2] sm:$0xff] %vm35_vm1, %v282_v37  ;;  %vm127_vm6 = vcmp.lt.s32.totalorder %v97_v25, 16  ;;  %s187_s1 = sshll.u32 %s284_s0, 4  ;;  %s188_s1 = int_to_ptr.vmem [resolvable:$true] %s187_s1 }
   0xc   :  { %87 = vmatpush.msra.mxu0 %v41_v3  ;;  %v50_v12 = vadd.f32 %v49_v10, %v47_v7 }
   0xe   :  { %88 = vmatpush.msra.mxu0 %v40_v5  ;;  %v51_v13 = vadd.f32 %v50_v12, %v48_v9 }
   0xf   :  { %199 = vmatmul.msk.f32.vlgmr.msra.gmra.mxu0 %vm69_vm0, %v39_v11  ;;  %v136_v1 = vld [vmem:[#allocation3] sm:$0xff] }
  0x10   :  { %v52_v14 = vrot.slane %v51_v13, 4  ;;  %v117_v49 = vld [vmem:[#allocation4] sm:$0xff] }
  0x11   :  { %v129_v55 = vld [vmem:[#allocation2] sm:$0xff] }
  0x12   :  { %v53_v15 = vadd.f32 %v52_v14, %v51_v13 }
  0x14   :  { %v54_v16 = vrot.slane %v53_v15, 2 }
  0x16   :  { %v55_v17 = vadd.f32 %v54_v16, %v53_v15 }
  0x18   :  { %v56_v18 = vrot.slane %v55_v17, 1 }
  0x1a   :  { %v57_v19 = vadd.f32 %v56_v18, %v55_v17 }
  0x1c   :  { %v58_v20 = vmax.f32 %v57_v19, 1e-24 }
  0x1e   :  { %215 = vrsqrt.f32 %v58_v20  ;;  %vm65_vm3 = vweird.f32 %v58_v20 }
  0x24   :  { %v216_v21 = vpop.eup %215 }
  0x25   :  { %v60_v24 = vmul.f32 %v216_v21, %v58_v20  ;;  %vm66_vm4 = vweird.f32 %v216_v21  ;;  %v283_v20 = vmov 8.0  }
  0x26   :  { %vm67_vm5 = vmor %vm65_vm3, %vm66_vm4 }
  0x27   :  { %v61_v26 = vmul.f32 %v216_v21, %v60_v24 }
  0x29   :  { %v62_v29 = vmul.f32 0.5, %v61_v26 }
  0x2b   :  { %v63_v30 = vsub.f32 1.5, %v62_v29 }
  0x2d   :  { %v64_v31 = vmul.f32 %v216_v21, %v63_v30 }
  0x2f   :  { %v68_v32 = vsel %vm67_vm5, %v216_v21, %v64_v31 }
  0x7b   :  { %v103_v27 = vpop.permute.xlu0 %102 }
  0x7c   :  { %vm104_vm2 = vcmp.eq.s32.totalorder %v97_v25, %v103_v27 }
  0x7d   :  { %v105_v28 = vsel %vm104_vm2, 1.0, %v281_v23 }
  0x7e   :  { %106 = vadd.xlane.f32.xlu1 %v105_v28 }
  0x8c   :  { %v90_v33 = vpop.f32.mrf.mxu0 }
  0x8d   :  { %v93_v34 = vmul.f32 %v90_v33, %v68_v32 }
  0x8f   :  { %v200_v35 = vclamps-f32 %v93_v34, 1.0 }
  0x91   :  { %v108_v36 = vmul.f32 %v200_v35, %v105_v28  ;;  %v121_v38 = vadd.f32 0.25, %v200_v35  ;;  %v202_v42 = vadd.f32 -0.25, %v200_v35 }
  0x93   :  { %109 = vadd.xlane.f32.xlu0 %v108_v36  ;;  %v122_v40 = vmax.f32 %v121_v38, 0.0 }
  0x95   :  { %v124_v46 = vmul.f32 %v202_v42, %v122_v40 }
  0x97   :  { %v125_v51 = vmul.f32 64.0, %v124_v46 }
  0xf1   :  { %v107_v48 = vpop.xlane.xlu1 %106 }
 0x106   :  { %v110_v39 = vpop.xlane.xlu0 %109 }
 0x107   :  { %v111_v41 = vsub.f32 1.25, %v110_v39  ;;  %v201_v44 = vadd.f32 -0.75, %v110_v39 }
 0x109   :  { %v112_v43 = vmax.f32 %v111_v41, 0.0 }
 0x10b   :  { %v114_v45 = vmul.f32 %v201_v44, %v112_v43 }
 0x10d   :  { %v115_v47 = vmul.f32 64.0, %v114_v45 }
 0x10f   :  { %v116_v50 = vmul.f32 %v115_v47, %v107_v48 }
 0x111   :  { %v118_v52 = vadd.f32 %v117_v49, %v116_v50  ;;  %v126_v53 = vsel %vm104_vm2, %v116_v50, %v125_v51 }
 0x112   :  { %v128_v54 = vsel %vm127_vm6, %v126_v53, -1e+30 }
 0x113   :  { %120 = vst.msk [vmem:[#allocation4] sm:$0xff] %vm35_vm1, %v118_v52  ;;  %130 = vmax.xlane.f32.xlu1 %v128_v54 }
 0x11a   :  { %v159_v10 = vld [vmem:[#allocation4] sm:$0xff] }
 0x186   :  { %v131_v56 = vpop.xlane.xlu1 %130 }
 0x187   :  { %v132_v57 = vmax.f32 %v129_v55, %v131_v56 }
 0x189   :  { %v133_v58 = vsub.f32 %v129_v55, %v132_v57  ;;  %150 = vst.msk [vmem:[#allocation2] sm:$0xff] %vm35_vm1, %v132_v57  ;;  %140 = vperm.xlu2 %214, %v132_v57  }
 0x18b   :  { %v134_v63 = vmul.f32 1.442695, %v133_v58 }
 0x190   :  { %v154_v8 = vld [vmem:[#allocation2] sm:$0xff] }
 0x1e3   :  { %v141_v59 = vpop.permute.xlu2 %140 }
 0x1e4   :  { %v143_v60 = vsub.f32 %v128_v54, %v141_v59 }
 0x1e6   :  { %v144_v61 = vmul.f32 1.442695, %v143_v60 }
 0x1e8   :  { %217 = vpow2.f32 %v144_v61 }
 0x1e9   :  { %219 = vpow2.f32 %v134_v63 }
 0x1ee   :  { %v218_v62 = vpop.eup %217 }
 0x1ef   :  { %146 = vadd.xlane.f32.xlu2 %v218_v62  ;;  %v220_v0 = vpop.eup %219 }
 0x1f0   :  { %v137_v2 = vmul.f32 %v220_v0, %v136_v1 }
 0x262   :  { %v147_v3 = vpop.xlane.xlu2 %146 }
 0x263   :  { %v148_v4 = vadd.f32 %v147_v3, %v137_v2 }
 0x265   :  { %149 = vst.msk [vmem:[#allocation3] sm:$0xff] %vm35_vm1, %v148_v4 }
 0x26c   :  { %v155_v5 = vld [vmem:[#allocation3] sm:$0xff] }
 0x26d   :  { %221 = vlog2.f32 %v155_v5 }
 0x26e   :  { %223 = vrcp.f32 %v283_v20 }
 0x273   :  { %v222_v6 = vpop.eup %221 }
 0x274   :  { %v157_v7 = vmul.f32 0.6931472, %v222_v6  ;;  %v224_v21 = vpop.eup %223 }
 0x275   :  { %v173_v22 = vmul.f32 8.0, %v224_v21  ;;  %vm177_vm7 = vweird.f32 %v224_v21 }
 0x276   :  { %v158_v9 = vadd.f32 %v157_v7, %v154_v8 }
 0x277   :  { %v174_v23 = vsub.f32 1.0, %v173_v22 }
 0x278   :  { %v160_v11 = vsub.f32 %v158_v9, %v159_v10 }
 0x279   :  { %v175_v24 = vmul.f32 %v224_v21, %v174_v23 }
 0x27a   :  { %v161_v12 = vsel %vm35_vm1, %v160_v11, 0.0 }
 0x27b   :  { %162 = vadd.xlane.f32.xlu1 %v161_v12  ;;  %v176_v25 = vadd.f32 %v224_v21, %v175_v24 }
 0x27d   :  { %v178_v26 = vsel %vm177_vm7, %v224_v21, %v176_v25 }
 0x2ee   :  { %v163_v13 = vpop.xlane.xlu1 %162 }
 0x2ef   :  { %v164_v14 = vrot.slane %v163_v13, 4 }
 0x2f1   :  { %v165_v15 = vadd.f32 %v164_v14, %v163_v13 }
 0x2f3   :  { %v166_v16 = vrot.slane %v165_v15, 2 }
 0x2f5   :  { %v167_v17 = vadd.f32 %v166_v16, %v165_v15 }
 0x2f7   :  { %v168_v18 = vrot.slane %v167_v17, 1 }
 0x2f9   :  { %v169_v19 = vadd.f32 %v168_v18, %v167_v17 }
 0x2fb   :  { %203 = vpush %v169_v19 }
 0x32c   :  { %s204_s25 = spop %203 }
 0x32d   :  { %v171_v27 = vstv %s204_s25 }
 0x32e   :  { %v179_v28 = vmul.f32 %v178_v26, %v171_v27 }
 0x330   :  { %181 = vst.msk [vmem:[#allocation8] sm:$0x1] %vm180_vm8, %v179_v28 }
 0x331   :  { %192 = dma.vmem_to_hbm [thread:$0]  %s188_s1, 16, %s190_s24, [#allocation7]  }
 0x332   :  { %275 = dma.done.wait [#allocation7], 16  }
 0x333   :  { %276 = vsyncadd [#allocation7], 4294967280 }
 0x334   :  { %197 = vsyncpa [#allocation6], 1 }
 0x335   :  { %198 = vsyncpa [#allocation7], 1 }

</bundles_post_ra>
